<compile_context>
chip_gen: v7x
topology: tpu7x:2x2x1
jax: 0.10.0
libtpu: 0.0.40
codegen_flags: <defaults>
</compile_context>

<pallas_src>
import functools

import jax
import jax.numpy as jnp
from jax.experimental import pallas as pl
from jax.experimental.pallas import tpu as pltpu


def _distill_loss_kernel(feat_ref, img_ref, wt_ref, s_ref, b_ref, out_ref,
                         acc_ref, *, inv_hw, n_chunks):
    # feat_ref: (tb, D)        student features (any float dtype)
    # img_ref:  (tbc, thw)     folded imgs tile (tbc = tb*C), native dtype
    # wt_ref:   (tbc, D)       teacher weight tiled to folded rows (w[i % C])
    # s_ref:    (tb, tbc)      channel-group-sum matrix (1 where i // C == t)
    # b_ref:    (1, D)         teacher bias
    # out_ref:  (1, 8, 128)    partial L1 sum, replicated (lane-dense store)
    # acc_ref:  (tbc, 128) f32 lane-parallel spatial-sum accumulator
    k = pl.program_id(1)

    @pl.when(k == 0)
    def _init():
        acc_ref[...] = jnp.zeros_like(acc_ref)

    # Hot loop: lane-parallel accumulation.  Each 128-lane chunk is loaded
    # straight from the VMEM tile (per-chunk loads keep vreg pressure low),
    # cast in-register, and added elementwise -- pure VALU work that hides
    # under the imgs DMA.  No cross-lane reduce, no masked stores per step.
    acc = acc_ref[...]
    for j in range(n_chunks):
        acc = acc + img_ref[:, pl.ds(j * 128, 128)].astype(jnp.float32)
    acc_ref[...] = acc

    @pl.when(k == pl.num_programs(1) - 1)
    def _finalize():
        # One cross-lane (XLU) reduce for the whole batch tile.
        row = jnp.sum(acc_ref[...], axis=-1, keepdims=True)           # (tbc, 1)
        # Synthetic teacher forward: GAP -> linear, expressed without any
        # in-kernel unfold/reshape: scale the tiled weight rows by the per
        # (batch, channel) spatial sums, then group-sum channels with one
        # tiny matmul.
        scaled = row * wt_ref[...]                                     # (tbc, D)
        teacher = jnp.dot(s_ref[...], scaled,
                          preferred_element_type=jnp.float32)          # (tb, D)
        teacher = teacher * jnp.float32(inv_hw) + b_ref[...]
        # L1 partial sum for this batch tile.
        diff = jnp.abs(feat_ref[...].astype(jnp.float32) - teacher)    # (tb, D)
        out_ref[...] = jnp.zeros_like(out_ref) + jnp.sum(diff)


def _pick_batch_tile(b, c, max_rows=128):
    """Largest batch tile whose folded row count (tb*C) stays register-friendly.

    A full-extent block (tb == B) is always legal; otherwise require tb to be
    a multiple of 8 so every block is sublane-aligned without masked stores.
    """
    cands = [b] if b * c <= max_rows else []
    for t in range(8, b + 1, 8):
        if b % t == 0 and t * c <= max_rows:
            cands.append(t)
    return max(cands) if cands else b


def _pick_hw_tile(hw_padded, folded_rows, itemsize,
                  budget_bytes=24 << 20, max_tile=16384):
    """Largest 128-multiple divisor of the (padded) spatial extent whose
    double-buffered imgs block fits the VMEM budget."""
    best = 128
    t = 128
    while t <= min(hw_padded, max_tile):
        if hw_padded % t == 0 and 2 * folded_rows * t * itemsize <= budget_bytes:
            best = t
        t += 128
    return best


def _pad_block_bytes(rows, cols, itemsize):
    return ((rows + 7) // 8) * 8 * ((cols + 127) // 128) * 128 * itemsize


def distill_loss(features, imgs_nchw, teacher_w, teacher_b):
    """features: (B, D), imgs_nchw: (B, C, H, W), teacher_w: (C, D), teacher_b: (D,)."""
    B, C, H, W = imgs_nchw.shape
    D = features.shape[1]
    HW = H * W

    # NCHW -> (B*C, HW): a free row-major reshape.  No transpose and no dtype
    # cast in the wrapper -- the kernel casts per tile, so bf16/uint8 images
    # stream at native width.
    imgs = imgs_nchw.reshape(B * C, HW)
    HWp = ((HW + 127) // 128) * 128
    if HWp != HW:
        # TODO(synk): ragged spatial extents take a one-time zero-pad copy; a
        # masked tail tile would avoid the extra HBM pass.
        imgs = jnp.pad(imgs, ((0, 0), (0, HWp - HW)))

    tb = _pick_batch_tile(B, C)
    tbc = tb * C
    itemsize = jnp.dtype(imgs.dtype).itemsize
    thw = _pick_hw_tile(HWp, tbc, itemsize)
    nb = B // tb
    nk = HWp // thw
    n_chunks = thw // 128

    # Tiny, built once: teacher params folded to match (batch*channel) rows.
    w = teacher_w.astype(jnp.float32)                       # (C, D)
    b2d = teacher_b.reshape(1, D).astype(jnp.float32)       # (1, D)
    wt = jnp.tile(w, (tb, 1))                               # (tbc, D)
    s = (jnp.arange(tbc)[None, :] // C
         == jnp.arange(tb)[:, None]).astype(jnp.float32)    # (tb, tbc)

    kernel = functools.partial(_distill_loss_kernel,
                               inv_hw=1.0 / float(HW), n_chunks=n_chunks)

    # VMEM budget from the actual (sublane/lane padded) block footprints.
    vmem_bytes = (
        2 * _pad_block_bytes(tbc, thw, itemsize)   # imgs double buffer
        + 2 * _pad_block_bytes(tb, D, 4)           # features
        + 2 * _pad_block_bytes(tbc, D, 4)          # tiled teacher W
        + 2 * _pad_block_bytes(tb, tbc, 4)         # channel-group-sum matrix
        + 2 * _pad_block_bytes(1, D, 4)            # bias
        + 2 * _pad_block_bytes(8, 128, 4)          # output block
        + _pad_block_bytes(tbc, 128, 4)            # accumulator scratch
    )
    vmem_limit = int(min(max(vmem_bytes + (8 << 20), 32 << 20), 48 << 20))

    cost = pl.CostEstimate(
        flops=B * C * HW + 2 * B * C * D + 2 * B * D,
        transcendentals=0,
        bytes_accessed=(B * C * HWp * itemsize + B * D * 4 + 2 * tbc * D * 4
                        + tb * tbc * 4 + D * 4 + nb * 8 * 128 * 4),
    )

    out = pl.pallas_call(
        kernel,
        out_shape=jax.ShapeDtypeStruct((nb, 8, 128), jnp.float32),
        grid_spec=pltpu.PrefetchScalarGridSpec(
            num_scalar_prefetch=0,
            grid=(nb, nk),                                      # HW reduction last
            in_specs=[
                pl.BlockSpec((tb, D), lambda b, k: (b, 0)),         # features
                pl.BlockSpec((tbc, thw), lambda b, k: (b, k)),      # folded imgs
                pl.BlockSpec((tbc, D), lambda b, k: (0, 0)),        # tiled teacher W
                pl.BlockSpec((tb, tbc), lambda b, k: (0, 0)),       # group-sum matrix
                pl.BlockSpec((1, D), lambda b, k: (0, 0)),          # teacher bias
            ],
            out_specs=pl.BlockSpec((1, 8, 128), lambda b, k: (b, 0, 0)),
            scratch_shapes=[pltpu.VMEM((tbc, 128), jnp.float32)],
        ),
        compiler_params=pltpu.CompilerParams(
            dimension_semantics=("parallel", "arbitrary"),
            vmem_limit_bytes=vmem_limit,
        ),
        cost_estimate=cost,
    )(features, imgs, wt, s, b2d)

    # L1Loss(reduction='mean') over the (B, D) feature tensor.
    return jnp.sum(out[:, 0, 0]) / jnp.float32(B * D)


def distill_loss_ref(features, imgs_nchw, teacher_w, teacher_b):
    # Pure-JAX reference (same synthetic teacher) for sanity checking.
    gap = jnp.mean(imgs_nchw.astype(jnp.float32), axis=(2, 3))     # (B, C)
    teacher_score = gap @ teacher_w + teacher_b                    # (B, D)
    return jnp.mean(jnp.abs(features.astype(jnp.float32) - teacher_score))


if __name__ == "__main__":
    # Small deterministic shapes: batch=2, channels=4, spatial=16x16, feat_dim=32
    B, C, H, W, D = 2, 4, 16, 16, 32

    key = jax.random.PRNGKey(0)
    k1, k2, k3, k4 = jax.random.split(key, 4)

    features = jax.random.normal(k1, (B, D), dtype=jnp.float32)     # student features
    imgs = jax.random.normal(k2, (B, C, H, W), dtype=jnp.float32)   # NCHW input images
    # Deterministic synthetic teacher parameters (GAP -> linear projection).
    teacher_w = jax.random.normal(k3, (C, D), dtype=jnp.float32) * 0.1
    teacher_b = jax.random.normal(k4, (D,), dtype=jnp.float32) * 0.01

    loss = distill_loss(features, imgs, teacher_w, teacher_b)
    jax.block_until_ready(loss)

    ref = distill_loss_ref(features, imgs, teacher_w, teacher_b)
    assert jnp.allclose(loss, ref, rtol=1e-5, atol=1e-5), (loss, ref)

    print("KERNEL_OK")
</pallas_src>

<mosaic_0001>
module attributes {stable_mosaic.version = 11 : i64} {
  func.func @_distill_loss_kernel(%arg0: i32, %arg1: i32, %arg2: memref<2x32xf32, #tpu.memory_space<vmem>>, %arg3: memref<8x256xf32, #tpu.memory_space<vmem>>, %arg4: memref<8x32xf32, #tpu.memory_space<vmem>>, %arg5: memref<2x8xf32, #tpu.memory_space<vmem>>, %arg6: memref<1x32xf32, #tpu.memory_space<vmem>>, %arg7: memref<1x8x128xf32, #tpu.memory_space<vmem>>, %arg8: memref<8x128xf32, #tpu.memory_space<vmem>>) attributes {dimension_semantics = [#tpu.dimension_semantics<parallel>, #tpu.dimension_semantics<arbitrary>], iteration_bounds = array<i64: 1, 1>, scalar_prefetch = 0 : i64, scratch_operands = 1 : i64, tpu.core_type = #tpu.core_type<tc>, window_params = [{transform_indices = @transform_0, window_bounds = array<i64: 2, 32>}, {transform_indices = @transform_1, window_bounds = array<i64: 8, 256>}, {pipeline_mode = #tpu.pipeline_mode<synchronous>, transform_indices = @transform_2, window_bounds = array<i64: 8, 32>}, {pipeline_mode = #tpu.pipeline_mode<synchronous>, transform_indices = @transform_3, window_bounds = array<i64: 2, 8>}, {pipeline_mode = #tpu.pipeline_mode<synchronous>, transform_indices = @transform_4, window_bounds = array<i64: 1, 32>}, {transform_indices = @transform_5, window_bounds = array<i64: 1, 8, 128>}]} {
    %c0_i32 = arith.constant 0 : i32
    %0 = arith.cmpi eq, %arg1, %c0_i32 : i32
    %1 = arith.extui %0 : i1 to i32
    %c0_i32_0 = arith.constant 0 : i32
    %2 = arith.cmpi ne, %1, %c0_i32_0 : i32
    scf.if %2 {
      %cst = arith.constant 0.000000e+00 : f32
      %12 = vector.broadcast %cst : f32 to vector<8x128xf32>
      %c0_9 = arith.constant 0 : index
      %c0_10 = arith.constant 0 : index
      %13 = vector.load %arg8[%c0_9, %c0_10] : memref<8x128xf32, #tpu.memory_space<vmem>>, vector<8x128xf32>
      tpu.vector_store %arg8[%c0_9, %c0_10], %12 {strides = array<i32>} : memref<8x128xf32, #tpu.memory_space<vmem>>, vector<8x128xf32>,
    } else {
    }
    %c0 = arith.constant 0 : index
    %c0_1 = arith.constant 0 : index
    %3 = vector.load %arg8[%c0, %c0_1] : memref<8x128xf32, #tpu.memory_space<vmem>>, vector<8x128xf32>
    %c0_2 = arith.constant 0 : index
    %c0_3 = arith.constant 0 : index
    %4 = vector.load %arg3[%c0_2, %c0_3] : memref<8x256xf32, #tpu.memory_space<vmem>>, vector<8x128xf32>
    %5 = arith.addf %3, %4 : vector<8x128xf32>
    %c0_4 = arith.constant 0 : index
    %c128 = arith.constant 128 : index
    %6 = vector.load %arg3[%c0_4, %c128] : memref<8x256xf32, #tpu.memory_space<vmem>>, vector<8x128xf32>
    %7 = arith.addf %5, %6 : vector<8x128xf32>
    %c0_5 = arith.constant 0 : index
    %c0_6 = arith.constant 0 : index
    %8 = vector.load %arg8[%c0_5, %c0_6] : memref<8x128xf32, #tpu.memory_space<vmem>>, vector<8x128xf32>
    tpu.vector_store %arg8[%c0_5, %c0_6], %7 {strides = array<i32>} : memref<8x128xf32, #tpu.memory_space<vmem>>, vector<8x128xf32>,
    %c0_i32_7 = arith.constant 0 : i32
    %9 = arith.cmpi eq, %arg1, %c0_i32_7 : i32
    %10 = arith.extui %9 : i1 to i32
    %c0_i32_8 = arith.constant 0 : i32
    %11 = arith.cmpi ne, %10, %c0_i32_8 : i32
    scf.if %11 {
      %c0_9 = arith.constant 0 : index
      %c0_10 = arith.constant 0 : index
      %12 = vector.load %arg8[%c0_9, %c0_10] : memref<8x128xf32, #tpu.memory_space<vmem>>, vector<8x128xf32>
      %cst = arith.constant dense<0.000000e+00> : vector<8xf32>
      %13 = vector.multi_reduction <add>, %12, %cst [1] : vector<8x128xf32> to vector<8xf32>
      %14 = vector.shape_cast %13 : vector<8xf32> to vector<8x1xf32>
      %c0_11 = arith.constant 0 : index
      %c0_12 = arith.constant 0 : index
      %15 = vector.load %arg4[%c0_11, %c0_12] : memref<8x32xf32, #tpu.memory_space<vmem>>, vector<8x32xf32>
      %16 = vector.broadcast %14 : vector<8x1xf32> to vector<8x32xf32>
      %17 = arith.mulf %16, %15 : vector<8x32xf32>
      %c0_13 = arith.constant 0 : index
      %c0_14 = arith.constant 0 : index
      %18 = vector.load %arg5[%c0_13, %c0_14] : memref<2x8xf32, #tpu.memory_space<vmem>>, vector<2x8xf32>
      %cst_15 = arith.constant dense<0.000000e+00> : vector<2x32xf32>
      %19 = tpu.matmul %18, %17, %cst_15 {dimension_numbers = #tpu.dot_dimension_numbers<[1], [0], [0], [1], [0, 0, 1, 1], [], []>} : vector<2x8xf32>, vector<8x32xf32>, vector<2x32xf32> -> vector<2x32xf32>
      %cst_16 = arith.constant 3.906250e-03 : f32
      %20 = vector.broadcast %cst_16 : f32 to vector<2x32xf32>
      %21 = arith.mulf %19, %20 : vector<2x32xf32>
      %c0_17 = arith.constant 0 : index
      %c0_18 = arith.constant 0 : index
      %22 = vector.load %arg6[%c0_17, %c0_18] : memref<1x32xf32, #tpu.memory_space<vmem>>, vector<1x32xf32>
      %23 = vector.broadcast %22 : vector<1x32xf32> to vector<2x32xf32>
      %24 = arith.addf %21, %23 : vector<2x32xf32>
      %c0_19 = arith.constant 0 : index
      %c0_20 = arith.constant 0 : index
      %25 = vector.load %arg2[%c0_19, %c0_20] : memref<2x32xf32, #tpu.memory_space<vmem>>, vector<2x32xf32>
      %26 = arith.subf %25, %24 : vector<2x32xf32>
      %27 = math.absf %26 : vector<2x32xf32>
      %cst_21 = arith.constant 0.000000e+00 : f32
      %28 = vector.broadcast %cst_21 : f32 to vector<1x8x128xf32>
      %29 = vector.shape_cast %27 : vector<2x32xf32> to vector<1x2x32xf32>
      %cst_22 = arith.constant dense<0.000000e+00> : vector<1xf32>
      %30 = vector.multi_reduction <add>, %29, %cst_22 [1, 2] : vector<1x2x32xf32> to vector<1xf32>
      %31 = vector.shape_cast %30 : vector<1xf32> to vector<1x1x1xf32>
      %32 = vector.extract %31[0, 0, 0] : f32 from vector<1x1x1xf32>
      %33 = vector.broadcast %32 : f32 to vector<1x8x128xf32>
      %34 = arith.addf %28, %33 : vector<1x8x128xf32>
      %c0_23 = arith.constant 0 : index
      %c0_24 = arith.constant 0 : index
      %c0_25 = arith.constant 0 : index
      %35 = vector.load %arg7[%c0_23, %c0_24, %c0_25] : memref<1x8x128xf32, #tpu.memory_space<vmem>>, vector<1x8x128xf32>
      tpu.vector_store %arg7[%c0_23, %c0_24, %c0_25], %34 {strides = array<i32>} : memref<1x8x128xf32, #tpu.memory_space<vmem>>, vector<1x8x128xf32>,
    } else {
    }
    return
  }
  func.func @transform_0(%arg0: i32, %arg1: i32) -> (i32, i32) {
    %c0_i32 = arith.constant 0 : i32
    %c0_i32_0 = arith.constant 0 : i32
    return %arg0, %c0_i32 : i32, i32
  }
  func.func @transform_1(%arg0: i32, %arg1: i32) -> (i32, i32) {
    %c0_i32 = arith.constant 0 : i32
    return %arg0, %arg1 : i32, i32
  }
  func.func @transform_2(%arg0: i32, %arg1: i32) -> (i32, i32) {
    %c0_i32 = arith.constant 0 : i32
    %c0_i32_0 = arith.constant 0 : i32
    %c0_i32_1 = arith.constant 0 : i32
    return %c0_i32, %c0_i32_0 : i32, i32
  }
  func.func @transform_3(%arg0: i32, %arg1: i32) -> (i32, i32) {
    %c0_i32 = arith.constant 0 : i32
    %c0_i32_0 = arith.constant 0 : i32
    %c0_i32_1 = arith.constant 0 : i32
    return %c0_i32, %c0_i32_0 : i32, i32
  }
  func.func @transform_4(%arg0: i32, %arg1: i32) -> (i32, i32) {
    %c0_i32 = arith.constant 0 : i32
    %c0_i32_0 = arith.constant 0 : i32
    %c0_i32_1 = arith.constant 0 : i32
    return %c0_i32, %c0_i32_0 : i32, i32
  }
  func.func @transform_5(%arg0: i32, %arg1: i32) -> (i32, i32, i32) {
    %c0_i32 = arith.constant 0 : i32
    %c0_i32_0 = arith.constant 0 : i32
    %c0_i32_1 = arith.constant 0 : i32
    return %arg0, %c0_i32, %c0_i32_0 : i32, i32, i32
  }
}

</mosaic_0001>

<bundles_post_ra>
// kernel: tpu_custom_call.1
= control target key start
LH: loop header
LB: loop body
LE: loop exit
PB: predicated region body
PF: predicated region fallthrough
CT: control target
= control target key end

     0   :  { %10 = vsyncpa [#allocation4], 0  ;;  %s393_s0 = inlined_call_operand.hbm [shape: f32[2,32], index: 0, kind: input, shape index: {}]   ;;  %s394_s1 = inlined_call_operand.hbm [shape: f32[8,256], index: 1, kind: input, shape index: {}]   ;;  %s395_s2 = inlined_call_operand.hbm [shape: f32[8,32], index: 2, kind: input, shape index: {}]   ;;  %s396_s3 = inlined_call_operand.vmem [shape: f32[2,8], index: 3, kind: input, shape index: {}]   ;;  %s397_s4 = inlined_call_operand.vmem [shape: f32[1,32], index: 4, kind: input, shape index: {}]   ;;  %s398_s5 = inlined_call_operand.hbm [shape: f32[1,8,128], index: 5, kind: output, shape index: {}]  }
   0x1   :  { %11 = vsyncpa [#allocation7], 0 }
   0x2   :  { %12 = vsyncpa [#allocation5], 0  ;;  %s303_s18 = smov [#allocation6]   ;;  %s304_s20 = smov [#allocation3]  }
   0x3   :  { %s29_s19 = sshll.u32 %s303_s18, 4  ;;  %s19_s21 = sshll.u32 %s304_s20, 4  ;;  %s30_s19 = int_to_ptr.vmem [resolvable:$true] %s29_s19  ;;  %s20_s21 = int_to_ptr.vmem [resolvable:$true] %s19_s21 }
   0x4   :  { %s209_s24 = scalar_lea.hbm %s394_s1, 256 }
   0x5   :  { %p210_p0 = scmp.ne.s32.totalorder %s394_s1, %s209_s24  ;;  %p213_p1 = scmp.lt.u32.totalorder %s209_s24, %s394_s1 }
   0x7   :  { %p215_p2 = pnand %p213_p1, %p210_p0 }
   0x9   :  { %218 = shalt.err (!%p215_p2)
}
   0xa   :  { %s219_s29 = scalar_lea.vmem %s30_s19, 256  ;;  %p224_p4 = scmp.lt.s32.totalorder %s30_s19, %s30_s19 }
   0xb   :  { %p220_p3 = scmp.ne.s32.totalorder %s30_s19, %s219_s29  ;;  %p225_p5 = scmp.lt.s32.totalorder %s219_s29, %s219_s29 }
   0xd   :  { %p226_p6 = por %p225_p5, %p224_p4 }
   0xf   :  { %p227_p7 = pnand %p226_p6, %p220_p3 }
  0x11   :  { %230 = shalt.err (!%p227_p7)
}
  0x12   :  { %32 = dma.hbm_to_vmem [thread:$0]  %s394_s1, 256, %s30_s19, [#allocation7]  }
  0x13   :  { %s231_s9 = scalar_lea.hbm %s393_s0, 32 }
  0x14   :  { %p232_p8 = scmp.ne.s32.totalorder %s393_s0, %s231_s9  ;;  %p235_p9 = scmp.lt.u32.totalorder %s231_s9, %s393_s0 }
  0x16   :  { %p237_p10 = pnand %p235_p9, %p232_p8 }
  0x18   :  { %240 = shalt.err (!%p237_p10)
}
  0x19   :  { %s241_s14 = scalar_lea.vmem %s20_s21, 32  ;;  %p246_p12 = scmp.lt.s32.totalorder %s20_s21, %s20_s21 }
  0x1a   :  { %p242_p11 = scmp.ne.s32.totalorder %s20_s21, %s241_s14  ;;  %p247_p13 = scmp.lt.s32.totalorder %s241_s14, %s241_s14 }
  0x1c   :  { %p248_p0 = por %p247_p13, %p246_p12 }
  0x1e   :  { %p249_p1 = pnand %p248_p0, %p242_p11 }
  0x20   :  { %252 = shalt.err (!%p249_p1)
}
  0x21   :  { %22 = dma.hbm_to_vmem [thread:$0]  %s393_s0, 32, %s20_s21, [#allocation4]  }
  0x22   :  { %s305_s16 = smov [#allocation8]   ;;  %s253_s20 = scalar_lea.hbm %s395_s2, 128 }
  0x23   :  { %s39_s17 = sshll.u32 %s305_s16, 4  ;;  %p254_p2 = scmp.ne.s32.totalorder %s395_s2, %s253_s20  ;;  %s40_s17 = int_to_ptr.vmem [resolvable:$true] %s39_s17 }
  0x24   :  { %p257_p3 = scmp.lt.u32.totalorder %s253_s20, %s395_s2 }
  0x26   :  { %p259_p4 = pnand %p257_p3, %p254_p2 }
  0x28   :  { %262 = shalt.err (!%p259_p4)
}
  0x29   :  { %s263_s26 = scalar_lea.vmem %s40_s17, 128  ;;  %p268_p6 = scmp.lt.s32.totalorder %s40_s17, %s40_s17 }
  0x2a   :  { %p264_p5 = scmp.ne.s32.totalorder %s40_s17, %s263_s26  ;;  %p269_p7 = scmp.lt.s32.totalorder %s263_s26, %s263_s26 }
  0x2c   :  { %p270_p8 = por %p269_p7, %p268_p6 }
  0x2e   :  { %p271_p9 = pnand %p270_p8, %p264_p5 }
  0x30   :  { %274 = shalt.err (!%p271_p9)
}
  0x31   :  { %42 = dma.hbm_to_vmem [thread:$0]  %s395_s2, 128, %s40_s17, [#allocation7]  }
  0x32   :  { %297 = dma.done.wait [#allocation4], 32  }
  0x33   :  { %298 = vsyncadd [#allocation4], 4294967264 }
  0x34   :  { %299 = dma.done.wait [#allocation7], 384  }
  0x35   :  { %300 = vsyncadd [#allocation7], 4294966912  ;;  %v62_v0 = vld [vmem:[#allocation6] sm:$0xff]  ;;  %v64_v1 = vld [vmem:[#allocation6 + $0x8] sm:$0xff]  ;;  %v306_v3 = vmov 0.0   ;;  %vm307_vm0 = vmmov 0  }
  0x36   :  { %v65_v2 = vadd.f32 %v64_v1, %v62_v0  ;;  %196 = vmatprep.subr.mxu0 %v306_v3  ;;  %198 = vmatprep.mubr.msk.f32.mxu0 %vm307_vm0, %v306_v3  ;;  %v73_v4 = vld [vmem:[#allocation8] sm:$0xff]  ;;  %v75_v7 = vld [vmem:[%s396_s3] sm:$0x3]  ;;  %vm76_vm1 = vcmask 64512   ;;  %vm162_vm2 = vcmask 254976   ;;  %s308_s3 = smov [#allocation9]  }
  0x37   :  { %v193_v9 = vld [vmem:[%s397_s4] ss:$0 sm:$0xff]  ;;  %s182_s30 = sshll.u32 %s308_s3, 4  ;;  %s183_s30 = int_to_ptr.vmem [resolvable:$true] %s182_s30 }
  0x38   :  { %71 = vadd.xlane.f32.xlu0 %v65_v2  ;;  %v159_v12 = vld [vmem:[#allocation3] sm:$0x3]  ;;  %s275_s6 = scalar_lea.vmem %s183_s30, 128  ;;  %p280_p11 = scmp.lt.s32.totalorder %s183_s30, %s183_s30 }
  0x39   :  { %p276_p10 = scmp.ne.s32.totalorder %s183_s30, %s275_s6  ;;  %p281_p12 = scmp.lt.s32.totalorder %s275_s6, %s275_s6 }
  0x3b   :  { %p282_p13 = por %p281_p12, %p280_p11 }
  0x3d   :  { %p283_p0 = pnand %p282_p13, %p276_p10 }
  0xc5   :  { %v72_v5 = vpop.xlane.xlu0 %71 }
  0xc6   :  { %v74_v6 = vmul.f32 %v73_v4, %v72_v5 }
  0xc8   :  { %197 = vmatpush3.msra.mxu0 %v74_v6 }
  0xc9   :  { %199 = vmatmul.mubr.msk.f32.vlgmr.msra.gmra.mrb[0].mxu0 %vm76_vm1, %v75_v7 }
 0x19c   :  { %v146_v8 = vpop.f32.mrb[0].mxu0 }
 0x19d   :  { %v150_v10 = vmul.f32 0.00390625, %v146_v8  ;;  %v200_v11 = vpop.f32.mrb[1].mxu0 }
 0x19f   :  { %v158_v13 = vadd.f32 %v193_v9, %v150_v10 }
 0x1a1   :  { %v160_v14 = vsub.f32 %v159_v12, %v158_v13 }
 0x1a3   :  { %v161_v15 = vand.u32 2147483647, %v160_v14 }
 0x1a5   :  { %v163_v16 = vsel %vm162_vm2, %v161_v15, 0.0 }
 0x1a6   :  { %164 = vadd.xlane.f32.xlu0 %v163_v16 }
 0x233   :  { %v165_v17 = vpop.xlane.xlu0 %164 }
 0x234   :  { %v166_v18 = vrot.slane %v165_v17, 4 }
 0x236   :  { %v167_v19 = vadd.f32 %v166_v18, %v165_v17 }
 0x238   :  { %v168_v20 = vrot.slane %v167_v19, 2 }
 0x23a   :  { %v169_v21 = vadd.f32 %v168_v20, %v167_v19 }
 0x23c   :  { %v170_v22 = vrot.slane %v169_v21, 1 }
 0x23e   :  { %v171_v23 = vadd.f32 %v170_v22, %v169_v21 }
 0x240   :  { %201 = vpush %v171_v23 }
 0x271   :  { %s202_s4 = spop %201 }
 0x272   :  { %v173_v24 = vstv %s202_s4 }
 0x273   :  { %175 = vst [vmem:[#allocation9] sm:$0xff] %v173_v24 }
 0x274   :  { %286 = shalt.err (!%p283_p0)
}
 0x275   :  { %s287_s9 = scalar_lea.hbm %s398_s5, 128 }
 0x276   :  { %p288_p1 = scmp.ne.s32.totalorder %s398_s5, %s287_s9  ;;  %p291_p2 = scmp.lt.u32.totalorder %s287_s9, %s398_s5 }
 0x278   :  { %p293_p3 = pnand %p291_p2, %p288_p1 }
 0x27a   :  { %296 = shalt.err (!%p293_p3)
}
 0x27b   :  { %185 = dma.vmem_to_hbm [thread:$0]  %s183_s30, 128, %s398_s5, [#allocation5]  }
 0x27c   :  { %301 = dma.done.wait [#allocation5], 128  }
 0x27d   :  { %302 = vsyncadd [#allocation5], 4294967168 }
 0x27e   :  { %189 = vsyncpa [#allocation4], 1 }
 0x27f   :  { %190 = vsyncpa [#allocation7], 1 }
 0x280   :  { %191 = vsyncpa [#allocation5], 1 }

</bundles_post_ra>
